<compile_context>
chip_gen: v5e
topology: v5e:2x2
jax: 0.10.0
libtpu: 0.0.40
codegen_flags: <defaults>
</compile_context>

<pallas_src>
import jax
import jax.numpy as jnp
from jax.experimental import pallas as pl
from jax.experimental.pallas import tpu as pltpu


def _round_up(v, m):
    return ((v + m - 1) // m) * m


def _mlp2_kernel(x_ref, w1_ref, b1_ref, w2_ref, b2_ref, w3_ref, b3_ref, o_ref):
    """Fused 3-layer MLP forward for one batch tile.

    x_ref  : VMEM (tm, In)
    w1_ref : VMEM (In, Hp)     b1_ref : VMEM (1, Hp)   (f32)
    w2_ref : VMEM (Hp, H2p)    b2_ref : VMEM (1, H2p)  (f32)
    w3_ref : VMEM (H2p, Op)    b3_ref : VMEM (1, Op)   (f32)
    o_ref  : VMEM (tm, Op)
    """
    slope = jnp.float32(0.2)

    # layer 1: Linear + LeakyReLU (f32 accumulation on the MXU)
    h = jnp.dot(x_ref[...], w1_ref[...],
                preferred_element_type=jnp.float32) + b1_ref[...]
    h = jnp.maximum(h, slope * h)

    # layer 2: Linear + LeakyReLU
    h = jnp.dot(h.astype(w2_ref.dtype), w2_ref[...],
                preferred_element_type=jnp.float32) + b2_ref[...]
    h = jnp.maximum(h, slope * h)

    # layer 3: Linear (logits)
    h = jnp.dot(h.astype(w3_ref.dtype), w3_ref[...],
                preferred_element_type=jnp.float32) + b3_ref[...]

    o_ref[...] = h.astype(o_ref.dtype)


def mlp2layer_forward(x, w1, b1, w2, b2, w3, b3, *,
                      block_m=256,
                      compute_dtype=jnp.bfloat16,
                      out_dtype=jnp.float32):
    """
    x  : (B, In)
    w1 : (In, H),   b1 : (H,)
    w2 : (H, H2),   b2 : (H2,)
    w3 : (H2, Out), b3 : (Out,)
    returns (B, Out) in out_dtype.

    compute_dtype: operand dtype for the MXU (default bf16 fast path);
    accumulation is always float32. Pass jnp.float32 (or None) for exact f32.
    """
    B, in_dim = x.shape
    hid = w1.shape[1]
    hid2 = w2.shape[1]
    out_dim = w3.shape[1]

    # ---- operand dtype (bf16 MXU fast path; f32 accumulation in-kernel) ----
    if compute_dtype is not None:
        x = x.astype(compute_dtype)
        w1 = w1.astype(compute_dtype)
        w2 = w2.astype(compute_dtype)
        w3 = w3.astype(compute_dtype)
    op_dtype = x.dtype

    # ---- pad feature dims up to lane width (128): unmasked output stores,
    #      full MXU/vreg lanes.  Zero padding is mathematically exact. ----
    hid_p = _round_up(hid, 128)
    hid2_p = _round_up(hid2, 128)
    out_p = _round_up(out_dim, 128)

    def pad_cols(w, new_c):
        return w if new_c == w.shape[1] else jnp.pad(w, ((0, 0), (0, new_c - w.shape[1])))

    def pad_rows(w, new_r):
        return w if new_r == w.shape[0] else jnp.pad(w, ((0, new_r - w.shape[0]), (0, 0)))

    def pad_bias(b, new_n):
        b = b.astype(jnp.float32)
        if new_n != b.shape[0]:
            b = jnp.pad(b, (0, new_n - b.shape[0]))
        return b.reshape(1, new_n)

    w1p = pad_cols(w1, hid_p)
    w2p = pad_cols(pad_rows(w2, hid_p), hid2_p)
    w3p = pad_cols(pad_rows(w3, hid2_p), out_p)
    b1p = pad_bias(b1, hid_p)
    b2p = pad_bias(b2, hid2_p)
    b3p = pad_bias(b3, out_p)

    # ---- batch tiling: large tiles for the 256-wide MXU, but guarantee >=2
    #      grid steps when possible so both v7x TensorCores get work. ----
    if B <= 8:
        tm = B                                    # full dim, no (8,) constraint
    elif B <= block_m:
        tm = max(8, _round_up(pl.cdiv(B, 2), 8))  # split batch across 2 TCs
    else:
        tm = block_m
    grid = (pl.cdiv(B, tm),)

    # ---- explicit VMEM budget (v5e default scoped limit is only 16 MiB;
    #      cap at 64 MiB so the same number is valid on v7x). ----
    op_bytes = jnp.dtype(op_dtype).itemsize
    out_bytes = jnp.dtype(out_dtype).itemsize
    w_bytes = (in_dim * hid_p + hid_p * hid2_p + hid2_p * out_p) * op_bytes
    b_bytes = (hid_p + hid2_p + out_p) * 4
    io_bytes = 2 * tm * in_dim * op_bytes + 2 * tm * out_p * out_bytes
    vmem_limit = int(max(16 << 20,
                         min(2 * w_bytes + b_bytes + io_bytes + (4 << 20),
                             64 << 20)))

    flops = 2 * B * (in_dim * hid_p + hid_p * hid2_p + hid2_p * out_p)
    bytes_accessed = int(B * in_dim * op_bytes + w_bytes + b_bytes
                         + B * out_p * out_bytes)
    cost = pl.CostEstimate(flops=flops, transcendentals=0,
                           bytes_accessed=bytes_accessed)

    def build_and_call(weight_mode):
        def wspec(shape):
            if weight_mode is None:
                return pl.BlockSpec(shape, lambda i: (0, 0))
            # resident operand (constant index_map) -> single pipeline buffer
            return pl.BlockSpec(shape, lambda i: (0, 0), pipeline_mode=weight_mode)

        grid_spec = pl.GridSpec(
            grid=grid,
            in_specs=[
                pl.BlockSpec((tm, in_dim), lambda i: (i, 0)),   # x tile (pipelined)
                wspec((in_dim, hid_p)),  wspec((1, hid_p)),     # w1, b1 (resident)
                wspec((hid_p, hid2_p)),  wspec((1, hid2_p)),    # w2, b2 (resident)
                wspec((hid2_p, out_p)),  wspec((1, out_p)),     # w3, b3 (resident)
            ],
            out_specs=pl.BlockSpec((tm, out_p), lambda i: (i, 0)),
        )
        return pl.pallas_call(
            _mlp2_kernel,
            out_shape=jax.ShapeDtypeStruct((B, out_p), out_dtype),
            grid_spec=grid_spec,
            compiler_params=pltpu.CompilerParams(
                dimension_semantics=("parallel",),   # shard batch tiles on v7x
                vmem_limit_bytes=vmem_limit),
            cost_estimate=cost,
        )(x, w1p, b1p, w2p, b2p, w3p, b3p)

    try:
        out = build_and_call(pl.Buffered(1))
    except Exception:
        # fallback for jax versions without BlockSpec.pipeline_mode / Buffered(1)
        out = build_and_call(None)

    return out[:, :out_dim] if out_p != out_dim else out


if __name__ == "__main__":
    # Small shapes implied by the module: a 3-layer classifier head.
    B, in_dim, hid_dim, out_dim = 8, 32, 64, 16
    hid2 = hid_dim // 2

    key = jax.random.PRNGKey(0)
    ks = jax.random.split(key, 7)
    x = jax.random.normal(ks[0], (B, in_dim), dtype=jnp.float32)
    w1 = jax.random.normal(ks[1], (in_dim, hid_dim), dtype=jnp.float32) * 0.1
    b1 = jax.random.normal(ks[2], (hid_dim,), dtype=jnp.float32) * 0.1
    w2 = jax.random.normal(ks[3], (hid_dim, hid2), dtype=jnp.float32) * 0.1
    b2 = jax.random.normal(ks[4], (hid2,), dtype=jnp.float32) * 0.1
    w3 = jax.random.normal(ks[5], (hid2, out_dim), dtype=jnp.float32) * 0.1
    b3 = jax.random.normal(ks[6], (out_dim,), dtype=jnp.float32) * 0.1

    # pure-JAX reference (dropout is identity at p=0 / inference)
    def leaky(v):
        return jnp.where(v > 0, v, 0.2 * v)

    ref = leaky(x @ w1 + b1)
    ref = leaky(ref @ w2 + b2)
    ref = ref @ w3 + b3

    # default path: bf16 operands (MXU fast path), f32 accumulation
    out_bf16 = jax.block_until_ready(
        mlp2layer_forward(x, w1, b1, w2, b2, w3, b3))
    assert out_bf16.shape == (B, out_dim)
    assert jnp.allclose(out_bf16, ref, atol=3e-2, rtol=3e-2), \
        "bf16-operand path mismatch vs reference"

    # exact f32 operand path for a tight numerical check
    out_f32 = jax.block_until_ready(
        mlp2layer_forward(x, w1, b1, w2, b2, w3, b3, compute_dtype=jnp.float32))
    assert out_f32.shape == (B, out_dim)
    assert jnp.allclose(out_f32, ref, atol=1e-4, rtol=1e-4), \
        "f32-operand path mismatch vs reference"

    print("KERNEL_OK")
</pallas_src>

<mosaic_0001>
module attributes {stable_mosaic.version = 11 : i64} {
  func.func @_mlp2_kernel(%arg0: i32, %arg1: memref<8x32xbf16, #tpu.memory_space<vmem>>, %arg2: memref<32x128xbf16, #tpu.memory_space<vmem>>, %arg3: memref<1x128xf32, #tpu.memory_space<vmem>>, %arg4: memref<128x128xbf16, #tpu.memory_space<vmem>>, %arg5: memref<1x128xf32, #tpu.memory_space<vmem>>, %arg6: memref<128x128xbf16, #tpu.memory_space<vmem>>, %arg7: memref<1x128xf32, #tpu.memory_space<vmem>>, %arg8: memref<8x128xf32, #tpu.memory_space<vmem>>) attributes {dimension_semantics = [#tpu.dimension_semantics<parallel>], iteration_bounds = array<i64: 1>, scalar_prefetch = 0 : i64, scratch_operands = 0 : i64, tpu.core_type = #tpu.core_type<tc>, window_params = [{transform_indices = @transform_0, window_bounds = array<i64: 8, 32>}, {pipeline_mode = #tpu.pipeline_mode<synchronous>, transform_indices = @transform_1, window_bounds = array<i64: 32, 128>}, {pipeline_mode = #tpu.pipeline_mode<synchronous>, transform_indices = @transform_2, window_bounds = array<i64: 1, 128>}, {pipeline_mode = #tpu.pipeline_mode<synchronous>, transform_indices = @transform_3, window_bounds = array<i64: 128, 128>}, {pipeline_mode = #tpu.pipeline_mode<synchronous>, transform_indices = @transform_4, window_bounds = array<i64: 1, 128>}, {pipeline_mode = #tpu.pipeline_mode<synchronous>, transform_indices = @transform_5, window_bounds = array<i64: 128, 128>}, {pipeline_mode = #tpu.pipeline_mode<synchronous>, transform_indices = @transform_6, window_bounds = array<i64: 1, 128>}, {transform_indices = @transform_7, window_bounds = array<i64: 8, 128>}]} {
    %c0 = arith.constant 0 : index
    %c0_0 = arith.constant 0 : index
    %0 = vector.load %arg1[%c0, %c0_0] : memref<8x32xbf16, #tpu.memory_space<vmem>>, vector<8x32xbf16>
    %c0_1 = arith.constant 0 : index
    %c0_2 = arith.constant 0 : index
    %1 = vector.load %arg2[%c0_1, %c0_2] : memref<32x128xbf16, #tpu.memory_space<vmem>>, vector<32x128xbf16>
    %cst = arith.constant dense<0.000000e+00> : vector<8x128xf32>
    %2 = tpu.matmul %0, %1, %cst {dimension_numbers = #tpu.dot_dimension_numbers<[1], [0], [0], [1], [0, 0, 1, 1], [], []>} : vector<8x32xbf16>, vector<32x128xbf16>, vector<8x128xf32> -> vector<8x128xf32>
    %c0_3 = arith.constant 0 : index
    %c0_4 = arith.constant 0 : index
    %3 = vector.load %arg3[%c0_3, %c0_4] : memref<1x128xf32, #tpu.memory_space<vmem>>, vector<1x128xf32>
    %4 = vector.broadcast %3 : vector<1x128xf32> to vector<8x128xf32>
    %5 = arith.addf %2, %4 : vector<8x128xf32>
    %cst_5 = arith.constant 2.000000e-01 : f32
    %6 = vector.broadcast %cst_5 : f32 to vector<8x128xf32>
    %7 = arith.mulf %6, %5 : vector<8x128xf32>
    %8 = arith.maximumf %5, %7 : vector<8x128xf32>
    %9 = arith.truncf %8 : vector<8x128xf32> to vector<8x128xbf16>
    %c0_6 = arith.constant 0 : index
    %c0_7 = arith.constant 0 : index
    %10 = vector.load %arg4[%c0_6, %c0_7] : memref<128x128xbf16, #tpu.memory_space<vmem>>, vector<128x128xbf16>
    %cst_8 = arith.constant dense<0.000000e+00> : vector<8x128xf32>
    %11 = tpu.matmul %9, %10, %cst_8 {dimension_numbers = #tpu.dot_dimension_numbers<[1], [0], [0], [1], [0, 0, 1, 1], [], []>} : vector<8x128xbf16>, vector<128x128xbf16>, vector<8x128xf32> -> vector<8x128xf32>
    %c0_9 = arith.constant 0 : index
    %c0_10 = arith.constant 0 : index
    %12 = vector.load %arg5[%c0_9, %c0_10] : memref<1x128xf32, #tpu.memory_space<vmem>>, vector<1x128xf32>
    %13 = vector.broadcast %12 : vector<1x128xf32> to vector<8x128xf32>
    %14 = arith.addf %11, %13 : vector<8x128xf32>
    %cst_11 = arith.constant 2.000000e-01 : f32
    %15 = vector.broadcast %cst_11 : f32 to vector<8x128xf32>
    %16 = arith.mulf %15, %14 : vector<8x128xf32>
    %17 = arith.maximumf %14, %16 : vector<8x128xf32>
    %18 = arith.truncf %17 : vector<8x128xf32> to vector<8x128xbf16>
    %c0_12 = arith.constant 0 : index
    %c0_13 = arith.constant 0 : index
    %19 = vector.load %arg6[%c0_12, %c0_13] : memref<128x128xbf16, #tpu.memory_space<vmem>>, vector<128x128xbf16>
    %cst_14 = arith.constant dense<0.000000e+00> : vector<8x128xf32>
    %20 = tpu.matmul %18, %19, %cst_14 {dimension_numbers = #tpu.dot_dimension_numbers<[1], [0], [0], [1], [0, 0, 1, 1], [], []>} : vector<8x128xbf16>, vector<128x128xbf16>, vector<8x128xf32> -> vector<8x128xf32>
    %c0_15 = arith.constant 0 : index
    %c0_16 = arith.constant 0 : index
    %21 = vector.load %arg7[%c0_15, %c0_16] : memref<1x128xf32, #tpu.memory_space<vmem>>, vector<1x128xf32>
    %22 = vector.broadcast %21 : vector<1x128xf32> to vector<8x128xf32>
    %23 = arith.addf %20, %22 : vector<8x128xf32>
    %c0_17 = arith.constant 0 : index
    %c0_18 = arith.constant 0 : index
    %24 = vector.load %arg8[%c0_17, %c0_18] : memref<8x128xf32, #tpu.memory_space<vmem>>, vector<8x128xf32>
    tpu.vector_store %arg8[%c0_17, %c0_18], %23 {strides = array<i32>} : memref<8x128xf32, #tpu.memory_space<vmem>>, vector<8x128xf32>,
    return
  }
  func.func @transform_0(%arg0: i32) -> (i32, i32) {
    %c0_i32 = arith.constant 0 : i32
    %c0_i32_0 = arith.constant 0 : i32
    return %arg0, %c0_i32 : i32, i32
  }
  func.func @transform_1(%arg0: i32) -> (i32, i32) {
    %c0_i32 = arith.constant 0 : i32
    %c0_i32_0 = arith.constant 0 : i32
    %c0_i32_1 = arith.constant 0 : i32
    return %c0_i32, %c0_i32_0 : i32, i32
  }
  func.func @transform_2(%arg0: i32) -> (i32, i32) {
    %c0_i32 = arith.constant 0 : i32
    %c0_i32_0 = arith.constant 0 : i32
    %c0_i32_1 = arith.constant 0 : i32
    return %c0_i32, %c0_i32_0 : i32, i32
  }
  func.func @transform_3(%arg0: i32) -> (i32, i32) {
    %c0_i32 = arith.constant 0 : i32
    %c0_i32_0 = arith.constant 0 : i32
    %c0_i32_1 = arith.constant 0 : i32
    return %c0_i32, %c0_i32_0 : i32, i32
  }
  func.func @transform_4(%arg0: i32) -> (i32, i32) {
    %c0_i32 = arith.constant 0 : i32
    %c0_i32_0 = arith.constant 0 : i32
    %c0_i32_1 = arith.constant 0 : i32
    return %c0_i32, %c0_i32_0 : i32, i32
  }
  func.func @transform_5(%arg0: i32) -> (i32, i32) {
    %c0_i32 = arith.constant 0 : i32
    %c0_i32_0 = arith.constant 0 : i32
    %c0_i32_1 = arith.constant 0 : i32
    return %c0_i32, %c0_i32_0 : i32, i32
  }
  func.func @transform_6(%arg0: i32) -> (i32, i32) {
    %c0_i32 = arith.constant 0 : i32
    %c0_i32_0 = arith.constant 0 : i32
    %c0_i32_1 = arith.constant 0 : i32
    return %c0_i32, %c0_i32_0 : i32, i32
  }
  func.func @transform_7(%arg0: i32) -> (i32, i32) {
    %c0_i32 = arith.constant 0 : i32
    %c0_i32_0 = arith.constant 0 : i32
    return %arg0, %c0_i32 : i32, i32
  }
}

module attributes {stable_mosaic.version = 11 : i64} {
  func.func @_mlp2_kernel(%arg0: i32, %arg1: memref<8x32xbf16, #tpu.memory_space<vmem>>, %arg2: memref<32x128xbf16, #tpu.memory_space<vmem>>, %arg3: memref<1x128xf32, #tpu.memory_space<vmem>>, %arg4: memref<128x128xbf16, #tpu.memory_space<vmem>>, %arg5: memref<1x128xf32, #tpu.memory_space<vmem>>, %arg6: memref<128x128xbf16, #tpu.memory_space<vmem>>, %arg7: memref<1x128xf32, #tpu.memory_space<vmem>>, %arg8: memref<8x128xf32, #tpu.memory_space<vmem>>) attributes {dimension_semantics = [#tpu.dimension_semantics<parallel>], iteration_bounds = array<i64: 1>, scalar_prefetch = 0 : i64, scratch_operands = 0 : i64, tpu.core_type = #tpu.core_type<tc>, window_params = [{transform_indices = @transform_0, window_bounds = array<i64: 8, 32>}, {pipeline_mode = #tpu.pipeline_mode<synchronous>, transform_indices = @transform_1, window_bounds = array<i64: 32, 128>}, {pipeline_mode = #tpu.pipeline_mode<synchronous>, transform_indices = @transform_2, window_bounds = array<i64: 1, 128>}, {pipeline_mode = #tpu.pipeline_mode<synchronous>, transform_indices = @transform_3, window_bounds = array<i64: 128, 128>}, {pipeline_mode = #tpu.pipeline_mode<synchronous>, transform_indices = @transform_4, window_bounds = array<i64: 1, 128>}, {pipeline_mode = #tpu.pipeline_mode<synchronous>, transform_indices = @transform_5, window_bounds = array<i64: 128, 128>}, {pipeline_mode = #tpu.pipeline_mode<synchronous>, transform_indices = @transform_6, window_bounds = array<i64: 1, 128>}, {transform_indices = @transform_7, window_bounds = array<i64: 8, 128>}]} {
    %c0 = arith.constant 0 : index
    %c0_0 = arith.constant 0 : index
    %0 = vector.load %arg1[%c0, %c0_0] : memref<8x32xbf16, #tpu.memory_space<vmem>>, vector<8x32xbf16>
    %c0_1 = arith.constant 0 : index
    %c0_2 = arith.constant 0 : index
    %1 = vector.load %arg2[%c0_1, %c0_2] : memref<32x128xbf16, #tpu.memory_space<vmem>>, vector<32x128xbf16>
    %cst = arith.constant dense<0.000000e+00> : vector<8x128xf32>
    %2 = tpu.matmul %0, %1, %cst {dimension_numbers = #tpu.dot_dimension_numbers<[1], [0], [0], [1], [0, 0, 1, 1], [], []>} : vector<8x32xbf16>, vector<32x128xbf16>, vector<8x128xf32> -> vector<8x128xf32>
    %c0_3 = arith.constant 0 : index
    %c0_4 = arith.constant 0 : index
    %3 = vector.load %arg3[%c0_3, %c0_4] : memref<1x128xf32, #tpu.memory_space<vmem>>, vector<1x128xf32>
    %4 = vector.broadcast %3 : vector<1x128xf32> to vector<8x128xf32>
    %5 = arith.addf %2, %4 : vector<8x128xf32>
    %cst_5 = arith.constant 2.000000e-01 : f32
    %6 = vector.broadcast %cst_5 : f32 to vector<8x128xf32>
    %7 = arith.mulf %6, %5 : vector<8x128xf32>
    %8 = arith.maximumf %5, %7 : vector<8x128xf32>
    %9 = arith.truncf %8 : vector<8x128xf32> to vector<8x128xbf16>
    %c0_6 = arith.constant 0 : index
    %c0_7 = arith.constant 0 : index
    %10 = vector.load %arg4[%c0_6, %c0_7] : memref<128x128xbf16, #tpu.memory_space<vmem>>, vector<128x128xbf16>
    %cst_8 = arith.constant dense<0.000000e+00> : vector<8x128xf32>
    %11 = tpu.matmul %9, %10, %cst_8 {dimension_numbers = #tpu.dot_dimension_numbers<[1], [0], [0], [1], [0, 0, 1, 1], [], []>} : vector<8x128xbf16>, vector<128x128xbf16>, vector<8x128xf32> -> vector<8x128xf32>
    %c0_9 = arith.constant 0 : index
    %c0_10 = arith.constant 0 : index
    %12 = vector.load %arg5[%c0_9, %c0_10] : memref<1x128xf32, #tpu.memory_space<vmem>>, vector<1x128xf32>
    %13 = vector.broadcast %12 : vector<1x128xf32> to vector<8x128xf32>
    %14 = arith.addf %11, %13 : vector<8x128xf32>
    %cst_11 = arith.constant 2.000000e-01 : f32
    %15 = vector.broadcast %cst_11 : f32 to vector<8x128xf32>
    %16 = arith.mulf %15, %14 : vector<8x128xf32>
    %17 = arith.maximumf %14, %16 : vector<8x128xf32>
    %18 = arith.truncf %17 : vector<8x128xf32> to vector<8x128xbf16>
    %c0_12 = arith.constant 0 : index
    %c0_13 = arith.constant 0 : index
    %19 = vector.load %arg6[%c0_12, %c0_13] : memref<128x128xbf16, #tpu.memory_space<vmem>>, vector<128x128xbf16>
    %cst_14 = arith.constant dense<0.000000e+00> : vector<8x128xf32>
    %20 = tpu.matmul %18, %19, %cst_14 {dimension_numbers = #tpu.dot_dimension_numbers<[1], [0], [0], [1], [0, 0, 1, 1], [], []>} : vector<8x128xbf16>, vector<128x128xbf16>, vector<8x128xf32> -> vector<8x128xf32>
    %c0_15 = arith.constant 0 : index
    %c0_16 = arith.constant 0 : index
    %21 = vector.load %arg7[%c0_15, %c0_16] : memref<1x128xf32, #tpu.memory_space<vmem>>, vector<1x128xf32>
    %22 = vector.broadcast %21 : vector<1x128xf32> to vector<8x128xf32>
    %23 = arith.addf %20, %22 : vector<8x128xf32>
    %c0_17 = arith.constant 0 : index
    %c0_18 = arith.constant 0 : index
    %24 = vector.load %arg8[%c0_17, %c0_18] : memref<8x128xf32, #tpu.memory_space<vmem>>, vector<8x128xf32>
    tpu.vector_store %arg8[%c0_17, %c0_18], %23 {strides = array<i32>} : memref<8x128xf32, #tpu.memory_space<vmem>>, vector<8x128xf32>,
    return
  }
  func.func @transform_0(%arg0: i32) -> (i32, i32) {
    %c0_i32 = arith.constant 0 : i32
    %c0_i32_0 = arith.constant 0 : i32
    return %arg0, %c0_i32 : i32, i32
  }
  func.func @transform_1(%arg0: i32) -> (i32, i32) {
    %c0_i32 = arith.constant 0 : i32
    %c0_i32_0 = arith.constant 0 : i32
    %c0_i32_1 = arith.constant 0 : i32
    return %c0_i32, %c0_i32_0 : i32, i32
  }
  func.func @transform_2(%arg0: i32) -> (i32, i32) {
    %c0_i32 = arith.constant 0 : i32
    %c0_i32_0 = arith.constant 0 : i32
    %c0_i32_1 = arith.constant 0 : i32
    return %c0_i32, %c0_i32_0 : i32, i32
  }
  func.func @transform_3(%arg0: i32) -> (i32, i32) {
    %c0_i32 = arith.constant 0 : i32
    %c0_i32_0 = arith.constant 0 : i32
    %c0_i32_1 = arith.constant 0 : i32
    return %c0_i32, %c0_i32_0 : i32, i32
  }
  func.func @transform_4(%arg0: i32) -> (i32, i32) {
    %c0_i32 = arith.constant 0 : i32
    %c0_i32_0 = arith.constant 0 : i32
    %c0_i32_1 = arith.constant 0 : i32
    return %c0_i32, %c0_i32_0 : i32, i32
  }
  func.func @transform_5(%arg0: i32) -> (i32, i32) {
    %c0_i32 = arith.constant 0 : i32
    %c0_i32_0 = arith.constant 0 : i32
    %c0_i32_1 = arith.constant 0 : i32
    return %c0_i32, %c0_i32_0 : i32, i32
  }
  func.func @transform_6(%arg0: i32) -> (i32, i32) {
    %c0_i32 = arith.constant 0 : i32
    %c0_i32_0 = arith.constant 0 : i32
    %c0_i32_1 = arith.constant 0 : i32
    return %c0_i32, %c0_i32_0 : i32, i32
  }
  func.func @transform_7(%arg0: i32) -> (i32, i32) {
    %c0_i32 = arith.constant 0 : i32
    %c0_i32_0 = arith.constant 0 : i32
    return %arg0, %c0_i32 : i32, i32
  }
}

</mosaic_0001>

<bundles_post_ra>
// kernel: tpu_custom_call.1
= control target key start
LH: loop header
LB: loop body
LE: loop exit
PB: predicated region body
PF: predicated region fallthrough
CT: control target
= control target key end

     0   :  { %12 = vsyncpa [#allocation3], 0  ;;  %s615_s0 = inlined_call_operand.hbm [shape: bf16[8,32], index: 0, kind: input, shape index: {}]   ;;  %s616_s1 = inlined_call_operand.hbm [shape: bf16[32,128], index: 1, kind: input, shape index: {}]   ;;  %s617_s2 = inlined_call_operand.vmem [shape: f32[1,128], index: 2, kind: input, shape index: {}]   ;;  %s618_s3 = inlined_call_operand.hbm [shape: bf16[128,128], index: 3, kind: input, shape index: {}]   ;;  %s619_s4 = inlined_call_operand.vmem [shape: f32[1,128], index: 4, kind: input, shape index: {}]   ;;  %s620_s5 = inlined_call_operand.hbm [shape: bf16[128,128], index: 5, kind: input, shape index: {}]   ;;  %s621_s6 = inlined_call_operand.vmem [shape: f32[1,128], index: 6, kind: input, shape index: {}]   ;;  %s622_s7 = inlined_call_operand.hbm [shape: f32[8,128], index: 7, kind: output, shape index: {}]  }
   0x1   :  { %13 = vsyncpa [#allocation6], 0 }
   0x2   :  { %14 = vsyncpa [#allocation9], 0  ;;  %s31_s26 = sshll.u32 %s616_s1, 4  ;;  %s32_s26 = int_to_ptr.hbm [resolvable:$true] %s31_s26 }
   0x3   :  { %15 = vsyncpa [#allocation4], 0  ;;  %s544_s27 = smov [#allocation5]   ;;  %s21_s8 = sshll.u32 %s615_s0, 4  ;;  %s22_s8 = int_to_ptr.hbm [resolvable:$true] %s21_s8 }
   0x4   :  { %s33_s28 = sshll.u32 %s544_s27, 4  ;;  %s545_s9 = smov 64   ;;  %s34_s28 = int_to_ptr.vmem [resolvable:$true] %s33_s28 }
   0x5   :  { %s546_s10 = smov 4   ;;  %s547_s11 = smov [#allocation2]  }
   0x6   :  { %39 = dma.hbm_to_vmem [thread:$0]  %s32_s26, 256, %s34_s28, [#allocation6], %s545_s9, %s545_s9, %s546_s10  }
   0x7   :  { %s23_s12 = sshll.u32 %s547_s11, 4  ;;  %s46_s15 = sshll.u32 %s618_s3, 4  ;;  %s24_s12 = int_to_ptr.vmem [resolvable:$true] %s23_s12  ;;  %s47_s15 = int_to_ptr.hbm [resolvable:$true] %s46_s15 }
   0x8   :  { %26 = dma.hbm_to_vmem [thread:$0]  %s22_s8, 64, %s24_s12, [#allocation3]  }
   0x9   :  { %s61_s17 = sshll.u32 %s620_s5, 4  ;;  %s548_s18 = smov [#allocation7]   ;;  %s62_s17 = int_to_ptr.hbm [resolvable:$true] %s61_s17 }
   0xa   :  { %s48_s19 = sshll.u32 %s548_s18, 4  ;;  %s549_s0 = smov [#allocation8]   ;;  %s49_s19 = int_to_ptr.vmem [resolvable:$true] %s48_s19 }
   0xb   :  { %54 = dma.hbm_to_vmem [thread:$0]  %s47_s15, 1024, %s49_s19, [#allocation6], %s545_s9, %s545_s9, %s546_s10  }
   0xc   :  { %s63_s20 = sshll.u32 %s549_s0, 4  ;;  %s64_s20 = int_to_ptr.vmem [resolvable:$true] %s63_s20 }
   0xd   :  { %69 = dma.hbm_to_vmem [thread:$0]  %s62_s17, 1024, %s64_s20, [#allocation9], %s545_s9, %s545_s9, %s546_s10  }
   0xe   :  { %536 = dma.done.wait [#allocation3], 64  }
   0xf   :  { %537 = vsyncadd [#allocation3], 4294967232 }
  0x10   :  { %538 = dma.done.wait [#allocation6], 1280  }
  0x11   :  { %539 = vsyncadd [#allocation6], 4294966016 }
  0x12   :  { %540 = dma.done.wait [#allocation9], 1024  }
  0x13   :  { %541 = vsyncadd [#allocation9], 4294966272  ;;  %v389_v0 = vld [vmem:[#allocation5 + $0x8] sm:$0xff]  ;;  %v388_v2 = vld [vmem:[#allocation5] sm:$0xff]  ;;  %vm110_vm0 = vcmask 261120   ;;  %s550_s24 = smov [#allocation10]  }
  0x14   :  { %v397_v1 = vld [vmem:[#allocation7 + $0x38] sm:$0xff]  ;;  %120 = vmatpush.bf16.msra.mxu0 %v389_v0  ;;  %v396_v3 = vld [vmem:[#allocation7 + $0x30] sm:$0xff]  ;;  %v89_v4 = vld [vmem:[#allocation2] sm:$0xf]  ;;  %s301_s25 = sshll.u32 %s550_s24, 4  ;;  %s303_s28 = sshll.u32 %s622_s7, 4  ;;  %s302_s25 = int_to_ptr.vmem [resolvable:$true] %s301_s25  ;;  %s304_s28 = int_to_ptr.hbm [resolvable:$true] %s303_s28 }
  0x15   :  { %198 = vmatpush.bf16.msra.mxu1 %v397_v1  ;;  %v395_v5 = vld [vmem:[#allocation7 + $0x28] sm:$0xff]  ;;  %v394_v6 = vld [vmem:[#allocation7 + $0x20] sm:$0xff]  ;;  %v393_v7 = vld [vmem:[#allocation7 + $0x18] sm:$0xff] }
  0x16   :  { %v392_v8 = vld [vmem:[#allocation7 + $0x10] sm:$0xff]  ;;  %v391_v9 = vld [vmem:[#allocation7 + $0x8] sm:$0xff]  ;;  %v390_v10 = vld [vmem:[#allocation7] sm:$0xff] }
  0x17   :  { %v405_v11 = vld [vmem:[#allocation8 + $0x38] sm:$0xff]  ;;  %v404_v12 = vld [vmem:[#allocation8 + $0x30] sm:$0xff]  ;;  %v403_v13 = vld [vmem:[#allocation8 + $0x28] sm:$0xff] }
  0x18   :  { %121 = vmatpush.bf16.msra.mxu0 %v388_v2  ;;  %282 = vmatpush.bf16.msra.mxu2 %v405_v11  ;;  %v402_v14 = vld [vmem:[#allocation8 + $0x20] sm:$0xff]  ;;  %v401_v15 = vld [vmem:[#allocation8 + $0x18] sm:$0xff]  ;;  %v400_v16 = vld [vmem:[#allocation8 + $0x10] sm:$0xff] }
  0x19   :  { %199 = vmatpush.bf16.msra.mxu1 %v396_v3  ;;  %v413_v17 = vld [vmem:[%s617_s2] ss:$0 sm:$0xff]  ;;  %v398_v25 = vld [vmem:[#allocation8] sm:$0xff] }
  0x1a   :  { %v399_v24 = vld [vmem:[#allocation8 + $0x8] sm:$0xff] }
  0x1b   :  { %323 = vmatmul.msk.bf16.vlgmr.msra.gmra.mxu0 %vm110_vm0, %v89_v4  ;;  %v414_v26 = vld [vmem:[%s619_s4] ss:$0 sm:$0xff] }
  0x1c   :  { %283 = vmatpush.bf16.msra.mxu2 %v404_v12  ;;  %v415_v33 = vld [vmem:[%s621_s6] ss:$0 sm:$0xff] }
  0x1d   :  { %200 = vmatpush.bf16.msra.mxu1 %v395_v5 }
  0x20   :  { %284 = vmatpush.bf16.msra.mxu2 %v403_v13 }
  0x21   :  { %201 = vmatpush.bf16.msra.mxu1 %v394_v6 }
  0x24   :  { %285 = vmatpush.bf16.msra.mxu2 %v402_v14 }
  0x25   :  { %202 = vmatpush.bf16.msra.mxu1 %v393_v7 }
  0x28   :  { %286 = vmatpush.bf16.msra.mxu2 %v401_v15 }
  0x29   :  { %203 = vmatpush.bf16.msra.mxu1 %v392_v8 }
  0x2c   :  { %287 = vmatpush.bf16.msra.mxu2 %v400_v16 }
  0x2d   :  { %204 = vmatpush.bf16.msra.mxu1 %v391_v9 }
  0x30   :  { %288 = vmatpush.bf16.msra.mxu2 %v399_v24 }
  0x31   :  { %205 = vmatpush.bf16.msra.mxu1 %v390_v10 }
  0x34   :  { %289 = vmatpush.bf16.msra.mxu2 %v398_v25 }
  0x98   :  { %v123_v18 = vpop.f32.mrf.mxu0 }
  0x99   :  { %v124_v19 = vadd.f32 %v413_v17, %v123_v18 }
  0x9b   :  { %v127_v20 = vmul.f32 0.2, %v124_v19 }
  0x9d   :  { %v128_v21 = vmax.f32 %v124_v19, %v127_v20 }
  0x9f   :  { %v129_v22 = vpack.c.bf16 %v128_v21, %v128_v21 }
  0xa0   :  { %v125_v23 = vpop.f32.mrf.mxu0 }
  0xa1   :  { %206 = vmatmul.bf16.vlgmr.msra.gmra.mxu1 %v129_v22 }
 0x11e   :  { %v207_v27 = vpop.f32.mrf.mxu1 }
 0x11f   :  { %v208_v28 = vadd.f32 %v414_v26, %v207_v27 }
 0x121   :  { %v211_v29 = vmul.f32 0.2, %v208_v28 }
 0x123   :  { %v212_v30 = vmax.f32 %v208_v28, %v211_v29 }
 0x125   :  { %v213_v31 = vpack.c.bf16 %v212_v30, %v212_v30 }
 0x126   :  { %v209_v32 = vpop.f32.mrf.mxu1 }
 0x127   :  { %290 = vmatmul.bf16.vlgmr.msra.gmra.mxu2 %v213_v31 }
 0x1aa   :  { %v291_v34 = vpop.f32.mrf.mxu2 }
 0x1ab   :  { %v292_v35 = vadd.f32 %v415_v33, %v291_v34 }
 0x1ad   :  { %295 = vst [vmem:[#allocation10] sm:$0xff] %v292_v35 }
 0x1ae   :  { %306 = dma.vmem_to_hbm [thread:$0]  %s302_s25, 128, %s304_s28, [#allocation4]  }
 0x1b2   :  { %v293_v36 = vpop.f32.mrf.mxu2 }
 0x1b3   :  { %542 = dma.done.wait [#allocation4], 128  }
 0x1b4   :  { %543 = vsyncadd [#allocation4], 4294967168 }
 0x1b5   :  { %311 = vsyncpa [#allocation3], 1 }
 0x1b6   :  { %312 = vsyncpa [#allocation6], 1 }
 0x1b7   :  { %313 = vsyncpa [#allocation9], 1 }
 0x1b8   :  { %314 = vsyncpa [#allocation4], 1 }

// kernel: tpu_custom_call.1
= control target key start
LH: loop header
LB: loop body
LE: loop exit
PB: predicated region body
PF: predicated region fallthrough
CT: control target
= control target key end

     0   :  { %12 = vsyncpa [#allocation3], 0  ;;  %s615_s0 = inlined_call_operand.hbm [shape: bf16[8,32], index: 0, kind: input, shape index: {}]   ;;  %s616_s1 = inlined_call_operand.hbm [shape: bf16[32,128], index: 1, kind: input, shape index: {}]   ;;  %s617_s2 = inlined_call_operand.vmem [shape: f32[1,128], index: 2, kind: input, shape index: {}]   ;;  %s618_s3 = inlined_call_operand.hbm [shape: bf16[128,128], index: 3, kind: input, shape index: {}]   ;;  %s619_s4 = inlined_call_operand.vmem [shape: f32[1,128], index: 4, kind: input, shape index: {}]   ;;  %s620_s5 = inlined_call_operand.hbm [shape: bf16[128,128], index: 5, kind: input, shape index: {}]   ;;  %s621_s6 = inlined_call_operand.vmem [shape: f32[1,128], index: 6, kind: input, shape index: {}]   ;;  %s622_s7 = inlined_call_operand.hbm [shape: f32[8,128], index: 7, kind: output, shape index: {}]  }
   0x1   :  { %13 = vsyncpa [#allocation6], 0 }
   0x2   :  { %14 = vsyncpa [#allocation9], 0  ;;  %s31_s26 = sshll.u32 %s616_s1, 4  ;;  %s32_s26 = int_to_ptr.hbm [resolvable:$true] %s31_s26 }
   0x3   :  { %15 = vsyncpa [#allocation4], 0  ;;  %s544_s27 = smov [#allocation5]   ;;  %s21_s8 = sshll.u32 %s615_s0, 4  ;;  %s22_s8 = int_to_ptr.hbm [resolvable:$true] %s21_s8 }
   0x4   :  { %s33_s28 = sshll.u32 %s544_s27, 4  ;;  %s545_s9 = smov 64   ;;  %s34_s28 = int_to_ptr.vmem [resolvable:$true] %s33_s28 }
   0x5   :  { %s546_s10 = smov 4   ;;  %s547_s11 = smov [#allocation2]  }
   0x6   :  { %39 = dma.hbm_to_vmem [thread:$0]  %s32_s26, 256, %s34_s28, [#allocation6], %s545_s9, %s545_s9, %s546_s10  }
   0x7   :  { %s23_s12 = sshll.u32 %s547_s11, 4  ;;  %s46_s15 = sshll.u32 %s618_s3, 4  ;;  %s24_s12 = int_to_ptr.vmem [resolvable:$true] %s23_s12  ;;  %s47_s15 = int_to_ptr.hbm [resolvable:$true] %s46_s15 }
   0x8   :  { %26 = dma.hbm_to_vmem [thread:$0]  %s22_s8, 64, %s24_s12, [#allocation3]  }
   0x9   :  { %s61_s17 = sshll.u32 %s620_s5, 4  ;;  %s548_s18 = smov [#allocation7]   ;;  %s62_s17 = int_to_ptr.hbm [resolvable:$true] %s61_s17 }
   0xa   :  { %s48_s19 = sshll.u32 %s548_s18, 4  ;;  %s549_s0 = smov [#allocation8]   ;;  %s49_s19 = int_to_ptr.vmem [resolvable:$true] %s48_s19 }
   0xb   :  { %54 = dma.hbm_to_vmem [thread:$0]  %s47_s15, 1024, %s49_s19, [#allocation6], %s545_s9, %s545_s9, %s546_s10  }
   0xc   :  { %s63_s20 = sshll.u32 %s549_s0, 4  ;;  %s64_s20 = int_to_ptr.vmem [resolvable:$true] %s63_s20 }
   0xd   :  { %69 = dma.hbm_to_vmem [thread:$0]  %s62_s17, 1024, %s64_s20, [#allocation9], %s545_s9, %s545_s9, %s546_s10  }
   0xe   :  { %536 = dma.done.wait [#allocation3], 64  }
   0xf   :  { %537 = vsyncadd [#allocation3], 4294967232 }
  0x10   :  { %538 = dma.done.wait [#allocation6], 1280  }
  0x11   :  { %539 = vsyncadd [#allocation6], 4294966016 }
  0x12   :  { %540 = dma.done.wait [#allocation9], 1024  }
  0x13   :  { %541 = vsyncadd [#allocation9], 4294966272  ;;  %v389_v0 = vld [vmem:[#allocation5 + $0x8] sm:$0xff]  ;;  %v388_v2 = vld [vmem:[#allocation5] sm:$0xff]  ;;  %vm110_vm0 = vcmask 261120   ;;  %s550_s24 = smov [#allocation10]  }
  0x14   :  { %v397_v1 = vld [vmem:[#allocation7 + $0x38] sm:$0xff]  ;;  %120 = vmatpush.bf16.msra.mxu0 %v389_v0  ;;  %v396_v3 = vld [vmem:[#allocation7 + $0x30] sm:$0xff]  ;;  %v89_v4 = vld [vmem:[#allocation2] sm:$0xf]  ;;  %s301_s25 = sshll.u32 %s550_s24, 4  ;;  %s303_s28 = sshll.u32 %s622_s7, 4  ;;  %s302_s25 = int_to_ptr.vmem [resolvable:$true] %s301_s25  ;;  %s304_s28 = int_to_ptr.hbm [resolvable:$true] %s303_s28 }
  0x15   :  { %198 = vmatpush.bf16.msra.mxu1 %v397_v1  ;;  %v395_v5 = vld [vmem:[#allocation7 + $0x28] sm:$0xff]  ;;  %v394_v6 = vld [vmem:[#allocation7 + $0x20] sm:$0xff]  ;;  %v393_v7 = vld [vmem:[#allocation7 + $0x18] sm:$0xff] }
  0x16   :  { %v392_v8 = vld [vmem:[#allocation7 + $0x10] sm:$0xff]  ;;  %v391_v9 = vld [vmem:[#allocation7 + $0x8] sm:$0xff]  ;;  %v390_v10 = vld [vmem:[#allocation7] sm:$0xff] }
  0x17   :  { %v405_v11 = vld [vmem:[#allocation8 + $0x38] sm:$0xff]  ;;  %v404_v12 = vld [vmem:[#allocation8 + $0x30] sm:$0xff]  ;;  %v403_v13 = vld [vmem:[#allocation8 + $0x28] sm:$0xff] }
  0x18   :  { %121 = vmatpush.bf16.msra.mxu0 %v388_v2  ;;  %282 = vmatpush.bf16.msra.mxu2 %v405_v11  ;;  %v402_v14 = vld [vmem:[#allocation8 + $0x20] sm:$0xff]  ;;  %v401_v15 = vld [vmem:[#allocation8 + $0x18] sm:$0xff]  ;;  %v400_v16 = vld [vmem:[#allocation8 + $0x10] sm:$0xff] }
  0x19   :  { %199 = vmatpush.bf16.msra.mxu1 %v396_v3  ;;  %v413_v17 = vld [vmem:[%s617_s2] ss:$0 sm:$0xff]  ;;  %v398_v25 = vld [vmem:[#allocation8] sm:$0xff] }
  0x1a   :  { %v399_v24 = vld [vmem:[#allocation8 + $0x8] sm:$0xff] }
  0x1b   :  { %323 = vmatmul.msk.bf16.vlgmr.msra.gmra.mxu0 %vm110_vm0, %v89_v4  ;;  %v414_v26 = vld [vmem:[%s619_s4] ss:$0 sm:$0xff] }
  0x1c   :  { %283 = vmatpush.bf16.msra.mxu2 %v404_v12  ;;  %v415_v33 = vld [vmem:[%s621_s6] ss:$0 sm:$0xff] }
  0x1d   :  { %200 = vmatpush.bf16.msra.mxu1 %v395_v5 }
  0x20   :  { %284 = vmatpush.bf16.msra.mxu2 %v403_v13 }
  0x21   :  { %201 = vmatpush.bf16.msra.mxu1 %v394_v6 }
  0x24   :  { %285 = vmatpush.bf16.msra.mxu2 %v402_v14 }
  0x25   :  { %202 = vmatpush.bf16.msra.mxu1 %v393_v7 }
  0x28   :  { %286 = vmatpush.bf16.msra.mxu2 %v401_v15 }
  0x29   :  { %203 = vmatpush.bf16.msra.mxu1 %v392_v8 }
  0x2c   :  { %287 = vmatpush.bf16.msra.mxu2 %v400_v16 }
  0x2d   :  { %204 = vmatpush.bf16.msra.mxu1 %v391_v9 }
  0x30   :  { %288 = vmatpush.bf16.msra.mxu2 %v399_v24 }
  0x31   :  { %205 = vmatpush.bf16.msra.mxu1 %v390_v10 }
  0x34   :  { %289 = vmatpush.bf16.msra.mxu2 %v398_v25 }
  0x98   :  { %v123_v18 = vpop.f32.mrf.mxu0 }
  0x99   :  { %v124_v19 = vadd.f32 %v413_v17, %v123_v18 }
  0x9b   :  { %v127_v20 = vmul.f32 0.2, %v124_v19 }
  0x9d   :  { %v128_v21 = vmax.f32 %v124_v19, %v127_v20 }
  0x9f   :  { %v129_v22 = vpack.c.bf16 %v128_v21, %v128_v21 }
  0xa0   :  { %v125_v23 = vpop.f32.mrf.mxu0 }
  0xa1   :  { %206 = vmatmul.bf16.vlgmr.msra.gmra.mxu1 %v129_v22 }
 0x11e   :  { %v207_v27 = vpop.f32.mrf.mxu1 }
 0x11f   :  { %v208_v28 = vadd.f32 %v414_v26, %v207_v27 }
 0x121   :  { %v211_v29 = vmul.f32 0.2, %v208_v28 }
 0x123   :  { %v212_v30 = vmax.f32 %v208_v28, %v211_v29 }
 0x125   :  { %v213_v31 = vpack.c.bf16 %v212_v30, %v212_v30 }
 0x126   :  { %v209_v32 = vpop.f32.mrf.mxu1 }
 0x127   :  { %290 = vmatmul.bf16.vlgmr.msra.gmra.mxu2 %v213_v31 }
 0x1aa   :  { %v291_v34 = vpop.f32.mrf.mxu2 }
 0x1ab   :  { %v292_v35 = vadd.f32 %v415_v33, %v291_v34 }
 0x1ad   :  { %295 = vst [vmem:[#allocation10] sm:$0xff] %v292_v35 }
 0x1ae   :  { %306 = dma.vmem_to_hbm [thread:$0]  %s302_s25, 128, %s304_s28, [#allocation4]  }
 0x1b2   :  { %v293_v36 = vpop.f32.mrf.mxu2 }
 0x1b3   :  { %542 = dma.done.wait [#allocation4], 128  }
 0x1b4   :  { %543 = vsyncadd [#allocation4], 4294967168 }
 0x1b5   :  { %311 = vsyncpa [#allocation3], 1 }
 0x1b6   :  { %312 = vsyncpa [#allocation6], 1 }
 0x1b7   :  { %313 = vsyncpa [#allocation9], 1 }
 0x1b8   :  { %314 = vsyncpa [#allocation4], 1 }

</bundles_post_ra>
